<compile_context>
chip_gen: v7x
topology: tpu7x:2x2x1
jax: 0.10.0
libtpu: 0.0.40
codegen_flags: <defaults>
</compile_context>

<pallas_src>
import functools

import jax
import jax.numpy as jnp
from jax.experimental import pallas as pl
from jax.experimental.pallas import tpu as pltpu


def _cdiv(a: int, b: int) -> int:
    return -(-a // b)


def _round_up(n: int, m: int) -> int:
    return _cdiv(n, m) * m


def mlp_kernel(x_ref, w1_ref, b1_ref, w2_ref, b2_ref, o_ref, acc_ref):
    """One (batch-tile, hidden-tile) grid step.

    x_ref : (TB, D_in)  bf16
    w1_ref: (D_in, TH)  bf16   pre-transposed [K, N] layout
    b1_ref: (1, TH)     f32
    w2_ref: (TH, Dp)    bf16   pre-transposed [K, N] layout
    b2_ref: (1, Dp)     f32
    o_ref : (TB, Dp)    f32
    acc_ref:(TB, Dp)    f32 scratch accumulator (resident across hidden tiles)
    """
    hstep = pl.program_id(1)

    @pl.when(hstep == 0)
    def _init():
        acc_ref[...] = jnp.zeros_like(acc_ref)

    # Layer 1 tile: (TB, D_in) @ (D_in, TH) -> (TB, TH), f32 MXU accumulation.
    h = jnp.dot(x_ref[...], w1_ref[...], preferred_element_type=jnp.float32)
    # Fused bias-add + ReLU in f32 (VPU); (1, TH) bias broadcasts over sublanes.
    h = jnp.maximum(h + b1_ref[...], 0.0)
    # Layer 2 tile: (TB, TH) @ (TH, Dp) -> (TB, Dp), reduced over hidden tiles.
    acc_ref[...] += jnp.dot(h.astype(w2_ref.dtype), w2_ref[...],
                            preferred_element_type=jnp.float32)

    @pl.when(hstep == pl.num_programs(1) - 1)
    def _finalize():
        o_ref[...] = (acc_ref[...] + b2_ref[...]).astype(o_ref.dtype)


def prepare_params(w1, b1, w2, b2, compute_dtype=jnp.bfloat16):
    """One-time, parameter-load-time layout prep (NOT in the per-call hot path).

    * Transposes PyTorch (out_features, in_features) weights into the MXU-native
      [K, N] layout so the kernel never feeds a transposed operand.
    * Zero-pads hidden / output feature dims to lane-dense multiples of 128 (and
      to a multiple of the hidden tile when W1/W2 must be streamed). Exact:
      relu(0 + 0) = 0 and zero weight rows/cols contribute nothing.
    * Casts weights to bf16 (MXU-native on v5e/v6e/v7x); biases stay f32 and are
      added in the f32 epilogue; accumulation is f32 in the kernel.
      # TODO(synk): optional fp8 weight path with per-channel scales for v7x.

    Returns (params, d_out, th) where d_out / th are *static* Python ints
    (d_out must not travel through jit as a traced value).
    """
    H, D_in = w1.shape
    D_out = w2.shape[0]
    Dp = _round_up(D_out, 128)

    bw = jnp.dtype(compute_dtype).itemsize
    # If both weights (single-buffered, fully resident) fit comfortably inside
    # even v7x's 64-MiB VMEM, keep them resident (one hidden step). Otherwise
    # stream them over the hidden dim in 512-wide double-buffered tiles.
    hp128 = _round_up(H, 128)
    resident_bytes = (hp128 * D_in + hp128 * Dp) * bw
    th = hp128 if resident_bytes <= 24 * (1 << 20) else 512
    Hp = _round_up(H, th)

    w1p = jnp.zeros((D_in, Hp), compute_dtype).at[:, :H].set(
        w1.T.astype(compute_dtype))
    b1p = jnp.zeros((1, Hp), jnp.float32).at[0, :H].set(b1.astype(jnp.float32))
    w2p = jnp.zeros((Hp, Dp), compute_dtype).at[:H, :D_out].set(
        w2.T.astype(compute_dtype))
    b2p = jnp.zeros((1, Dp), jnp.float32).at[0, :D_out].set(
        b2.astype(jnp.float32))
    return (w1p, b1p, w2p, b2p), int(D_out), int(th)


@functools.partial(jax.jit, static_argnames=("d_out", "th"))
def two_layer_mlp(x, params, *, d_out, th):
    """x: (B, D_in) f32; (params, d_out, th) from prepare_params."""
    w1p, b1p, w2p, b2p = params
    B, D_in = x.shape
    Hp = w1p.shape[1]
    Dp = w2p.shape[1]
    nh = Hp // th
    compute_dtype = w1p.dtype
    bw = jnp.dtype(compute_dtype).itemsize

    # ---- Batch tiling --------------------------------------------------------
    # >= 2 grid steps whenever B allows, so the "parallel" batch axis spans both
    # TensorCores on v7x (neutral on single-TC v5e/v6e); at most one tile of
    # batch padding; 16-row granularity keeps bf16 sublane packing dense.
    nt = max(2, _cdiv(B, 512))
    nt = min(nt, max(1, B // 16))
    TB = _round_up(_cdiv(B, nt), 16)

    # ---- Generation-aware VMEM budget ----------------------------------------
    try:
        vmem_cap = pltpu.get_tpu_info().vmem_capacity_bytes
    except Exception:
        vmem_cap = 64 * (1 << 20)          # fall back to the smallest (v7x) part
    budget = int(0.75 * vmem_cap)          # ~48 MiB v7x, ~96 MiB v5e/v6e

    w_bufs = 1 if nh == 1 else 2           # resident weights single-buffered

    def vmem_est(tb):
        return (2 * tb * D_in * bw                      # x tile, double-buffered
                + 2 * tb * Dp * 4                       # out tile (f32), double-buffered
                + tb * Dp * 4                           # f32 accumulator scratch
                + tb * th * (4 + bw)                    # f32 hidden intermediate + bf16 cast
                + w_bufs * (D_in * th + th * Dp) * bw   # W1 / W2 tiles
                + w_bufs * th * 4 + Dp * 4)             # biases

    while vmem_est(TB) > budget and TB > 16:
        TB = _round_up(TB // 2, 16)
    # TODO(synk): also tile D_in (first-layer contraction) if input features ever
    # grow so large that the (TB, D_in) x-tile alone blows the VMEM budget.

    pB = _round_up(B, TB)
    x = x.astype(compute_dtype)
    if pB != B:
        x = jnp.pad(x, ((0, pB - B), (0, 0)))
    nb = pB // TB

    vmem_limit = int(min(budget, max(2 * vmem_est(TB) + (1 << 20), 16 << 20)))

    # Constant-index (resident) operands: single buffer. Streamed: default double.
    w_mode = pl.Buffered(1) if nh == 1 else None

    out_padded = pl.pallas_call(
        mlp_kernel,
        out_shape=jax.ShapeDtypeStruct((pB, Dp), jnp.float32),
        grid=(nb, nh),
        in_specs=[
            pl.BlockSpec((TB, D_in), lambda i, j: (i, 0)),          # x streams over batch
            pl.BlockSpec((D_in, th), lambda i, j: (0, j), pipeline_mode=w_mode),
            pl.BlockSpec((1, th), lambda i, j: (0, j), pipeline_mode=w_mode),
            pl.BlockSpec((th, Dp), lambda i, j: (j, 0), pipeline_mode=w_mode),
            pl.BlockSpec((1, Dp), lambda i, j: (0, 0), pipeline_mode=pl.Buffered(1)),
        ],
        out_specs=pl.BlockSpec((TB, Dp), lambda i, j: (i, 0)),
        scratch_shapes=[pltpu.VMEM((TB, Dp), jnp.float32)],
        compiler_params=pltpu.CompilerParams(
            dimension_semantics=("parallel", "arbitrary"),
            vmem_limit_bytes=vmem_limit,
        ),
    )(x, w1p, b1p, w2p, b2p)

    # Lane-dense padded output (unmasked full-width stores); strip padding here.
    # For production D_out that is already a multiple of 128 these slices are
    # no-ops; at tiny D_out the padded write stays cheaper than masked vst
    # (notably on v5e's single store slot).
    return out_padded[:B, :d_out]


if __name__ == "__main__":
    # Shapes implied by the module: x (batch, input_dim), fc1 -> hidden, fc2 -> output.
    batch, input_dim, hidden_dim, output_dim = 8, 32, 64, 16

    key = jax.random.PRNGKey(0)
    kx, kw1, kb1, kw2, kb2 = jax.random.split(key, 5)

    x = jax.random.normal(kx, (batch, input_dim), dtype=jnp.float32)

    # Deterministic PyTorch-style init: uniform(-1/sqrt(fan_in), 1/sqrt(fan_in)).
    bound1 = 1.0 / (input_dim ** 0.5)
    bound2 = 1.0 / (hidden_dim ** 0.5)
    w1 = jax.random.uniform(kw1, (hidden_dim, input_dim), jnp.float32, -bound1, bound1)
    b1 = jax.random.uniform(kb1, (hidden_dim,), jnp.float32, -bound1, bound1)
    w2 = jax.random.uniform(kw2, (output_dim, hidden_dim), jnp.float32, -bound2, bound2)
    b2 = jax.random.uniform(kb2, (output_dim,), jnp.float32, -bound2, bound2)

    # One-time layout prep (transpose + pad + bf16 cast), outside the hot path.
    params, d_out, th = prepare_params(w1, b1, w2, b2)

    out = two_layer_mlp(x, params, d_out=d_out, th=th)
    out = jax.block_until_ready(out)
    assert out.shape == (batch, output_dim), out.shape

    # Matched-precision reference: same bf16 operands, f32 accumulation.
    xb, w1b, w2b = (t.astype(jnp.bfloat16) for t in (x, w1, w2))
    h_ref = jnp.maximum(
        jnp.dot(xb, w1b.T, preferred_element_type=jnp.float32) + b1, 0.0)
    ref_bf16 = jnp.dot(h_ref.astype(jnp.bfloat16), w2b.T,
                       preferred_element_type=jnp.float32) + b2
    assert jnp.allclose(out, ref_bf16, atol=1e-3, rtol=1e-3), "mismatch vs bf16 reference"

    # Full-precision reference (same math as the PyTorch forward); loose tolerance
    # only accounts for the bf16 operand quantization.
    ref_f32 = jnp.maximum(x @ w1.T + b1, 0.0) @ w2.T + b2
    assert jnp.allclose(out, ref_f32, atol=5e-2, rtol=5e-2), "mismatch vs f32 reference"

    print("KERNEL_OK")
</pallas_src>

<mosaic_0001>
module attributes {stable_mosaic.version = 11 : i64} {
  func.func @mlp_kernel(%arg0: i32, %arg1: i32, %arg2: memref<16x32xbf16, #tpu.memory_space<vmem>>, %arg3: memref<32x128xbf16, #tpu.memory_space<vmem>>, %arg4: memref<1x128xf32, #tpu.memory_space<vmem>>, %arg5: memref<128x128xbf16, #tpu.memory_space<vmem>>, %arg6: memref<1x128xf32, #tpu.memory_space<vmem>>, %arg7: memref<16x128xf32, #tpu.memory_space<vmem>>, %arg8: memref<16x128xf32, #tpu.memory_space<vmem>>) attributes {dimension_semantics = [#tpu.dimension_semantics<parallel>, #tpu.dimension_semantics<arbitrary>], iteration_bounds = array<i64: 1, 1>, scalar_prefetch = 0 : i64, scratch_operands = 1 : i64, tpu.core_type = #tpu.core_type<tc>, window_params = [{transform_indices = @transform_0, window_bounds = array<i64: 16, 32>}, {pipeline_mode = #tpu.pipeline_mode<synchronous>, transform_indices = @transform_1, window_bounds = array<i64: 32, 128>}, {pipeline_mode = #tpu.pipeline_mode<synchronous>, transform_indices = @transform_2, window_bounds = array<i64: 1, 128>}, {pipeline_mode = #tpu.pipeline_mode<synchronous>, transform_indices = @transform_3, window_bounds = array<i64: 128, 128>}, {pipeline_mode = #tpu.pipeline_mode<synchronous>, transform_indices = @transform_4, window_bounds = array<i64: 1, 128>}, {transform_indices = @transform_5, window_bounds = array<i64: 16, 128>}]} {
    %c0_i32 = arith.constant 0 : i32
    %0 = arith.cmpi eq, %arg1, %c0_i32 : i32
    %1 = arith.extui %0 : i1 to i32
    %c0_i32_0 = arith.constant 0 : i32
    %2 = arith.cmpi ne, %1, %c0_i32_0 : i32
    scf.if %2 {
      %cst_16 = arith.constant 0.000000e+00 : f32
      %20 = vector.broadcast %cst_16 : f32 to vector<16x128xf32>
      %c0_17 = arith.constant 0 : index
      %c0_18 = arith.constant 0 : index
      %21 = vector.load %arg8[%c0_17, %c0_18] : memref<16x128xf32, #tpu.memory_space<vmem>>, vector<16x128xf32>
      tpu.vector_store %arg8[%c0_17, %c0_18], %20 {strides = array<i32>} : memref<16x128xf32, #tpu.memory_space<vmem>>, vector<16x128xf32>,
    } else {
    }
    %c0 = arith.constant 0 : index
    %c0_1 = arith.constant 0 : index
    %3 = vector.load %arg2[%c0, %c0_1] : memref<16x32xbf16, #tpu.memory_space<vmem>>, vector<16x32xbf16>
    %c0_2 = arith.constant 0 : index
    %c0_3 = arith.constant 0 : index
    %4 = vector.load %arg3[%c0_2, %c0_3] : memref<32x128xbf16, #tpu.memory_space<vmem>>, vector<32x128xbf16>
    %cst = arith.constant dense<0.000000e+00> : vector<16x128xf32>
    %5 = tpu.matmul %3, %4, %cst {dimension_numbers = #tpu.dot_dimension_numbers<[1], [0], [0], [1], [0, 0, 1, 1], [], []>} : vector<16x32xbf16>, vector<32x128xbf16>, vector<16x128xf32> -> vector<16x128xf32>
    %c0_4 = arith.constant 0 : index
    %c0_5 = arith.constant 0 : index
    %6 = vector.load %arg4[%c0_4, %c0_5] : memref<1x128xf32, #tpu.memory_space<vmem>>, vector<1x128xf32>
    %7 = vector.broadcast %6 : vector<1x128xf32> to vector<16x128xf32>
    %8 = arith.addf %5, %7 : vector<16x128xf32>
    %cst_6 = arith.constant 0.000000e+00 : f32
    %9 = vector.broadcast %cst_6 : f32 to vector<16x128xf32>
    %10 = arith.maximumf %8, %9 : vector<16x128xf32>
    %c0_7 = arith.constant 0 : index
    %c0_8 = arith.constant 0 : index
    %11 = vector.load %arg8[%c0_7, %c0_8] : memref<16x128xf32, #tpu.memory_space<vmem>>, vector<16x128xf32>
    %12 = arith.truncf %10 : vector<16x128xf32> to vector<16x128xbf16>
    %c0_9 = arith.constant 0 : index
    %c0_10 = arith.constant 0 : index
    %13 = vector.load %arg5[%c0_9, %c0_10] : memref<128x128xbf16, #tpu.memory_space<vmem>>, vector<128x128xbf16>
    %cst_11 = arith.constant dense<0.000000e+00> : vector<16x128xf32>
    %14 = tpu.matmul %12, %13, %cst_11 {dimension_numbers = #tpu.dot_dimension_numbers<[1], [0], [0], [1], [0, 0, 1, 1], [], []>} : vector<16x128xbf16>, vector<128x128xbf16>, vector<16x128xf32> -> vector<16x128xf32>
    %15 = arith.addf %11, %14 : vector<16x128xf32>
    %c0_12 = arith.constant 0 : index
    %c0_13 = arith.constant 0 : index
    %16 = vector.load %arg8[%c0_12, %c0_13] : memref<16x128xf32, #tpu.memory_space<vmem>>, vector<16x128xf32>
    tpu.vector_store %arg8[%c0_12, %c0_13], %15 {strides = array<i32>} : memref<16x128xf32, #tpu.memory_space<vmem>>, vector<16x128xf32>,
    %c0_i32_14 = arith.constant 0 : i32
    %17 = arith.cmpi eq, %arg1, %c0_i32_14 : i32
    %18 = arith.extui %17 : i1 to i32
    %c0_i32_15 = arith.constant 0 : i32
    %19 = arith.cmpi ne, %18, %c0_i32_15 : i32
    scf.if %19 {
      %c0_16 = arith.constant 0 : index
      %c0_17 = arith.constant 0 : index
      %20 = vector.load %arg8[%c0_16, %c0_17] : memref<16x128xf32, #tpu.memory_space<vmem>>, vector<16x128xf32>
      %c0_18 = arith.constant 0 : index
      %c0_19 = arith.constant 0 : index
      %21 = vector.load %arg6[%c0_18, %c0_19] : memref<1x128xf32, #tpu.memory_space<vmem>>, vector<1x128xf32>
      %22 = vector.broadcast %21 : vector<1x128xf32> to vector<16x128xf32>
      %23 = arith.addf %20, %22 : vector<16x128xf32>
      %c0_20 = arith.constant 0 : index
      %c0_21 = arith.constant 0 : index
      %24 = vector.load %arg7[%c0_20, %c0_21] : memref<16x128xf32, #tpu.memory_space<vmem>>, vector<16x128xf32>
      tpu.vector_store %arg7[%c0_20, %c0_21], %23 {strides = array<i32>} : memref<16x128xf32, #tpu.memory_space<vmem>>, vector<16x128xf32>,
    } else {
    }
    return
  }
  func.func @transform_0(%arg0: i32, %arg1: i32) -> (i32, i32) {
    %c0_i32 = arith.constant 0 : i32
    %c0_i32_0 = arith.constant 0 : i32
    return %arg0, %c0_i32 : i32, i32
  }
  func.func @transform_1(%arg0: i32, %arg1: i32) -> (i32, i32) {
    %c0_i32 = arith.constant 0 : i32
    %c0_i32_0 = arith.constant 0 : i32
    return %c0_i32, %arg1 : i32, i32
  }
  func.func @transform_2(%arg0: i32, %arg1: i32) -> (i32, i32) {
    %c0_i32 = arith.constant 0 : i32
    %c0_i32_0 = arith.constant 0 : i32
    return %c0_i32, %arg1 : i32, i32
  }
  func.func @transform_3(%arg0: i32, %arg1: i32) -> (i32, i32) {
    %c0_i32 = arith.constant 0 : i32
    %c0_i32_0 = arith.constant 0 : i32
    return %arg1, %c0_i32 : i32, i32
  }
  func.func @transform_4(%arg0: i32, %arg1: i32) -> (i32, i32) {
    %c0_i32 = arith.constant 0 : i32
    %c0_i32_0 = arith.constant 0 : i32
    %c0_i32_1 = arith.constant 0 : i32
    return %c0_i32, %c0_i32_0 : i32, i32
  }
  func.func @transform_5(%arg0: i32, %arg1: i32) -> (i32, i32) {
    %c0_i32 = arith.constant 0 : i32
    %c0_i32_0 = arith.constant 0 : i32
    return %arg0, %c0_i32 : i32, i32
  }
}

</mosaic_0001>

<bundles_post_ra>
// kernel: two_layer_mlp.1
= control target key start
LH: loop header
LB: loop body
LE: loop exit
PB: predicated region body
PF: predicated region fallthrough
CT: control target
= control target key end

     0   :  { %10 = vsyncpa [#allocation4], 0  ;;  %s345_s18 = smov [#allocation3]   ;;  %s413_s0 = inlined_call_operand.vmem [shape: bf16[16,32], index: 0, kind: input, shape index: {}]   ;;  %s414_s1 = inlined_call_operand.vmem [shape: bf16[32,128], index: 1, kind: input, shape index: {}]   ;;  %s415_s2 = inlined_call_operand.vmem [shape: f32[1,128], index: 2, kind: input, shape index: {}]   ;;  %s416_s3 = inlined_call_operand.hbm [shape: bf16[128,128], index: 3, kind: input, shape index: {}]   ;;  %s417_s4 = inlined_call_operand.vmem [shape: f32[1,128], index: 4, kind: input, shape index: {}]   ;;  %s418_s5 = inlined_call_operand.vmem [shape: f32[16,128], index: 5, kind: output, shape index: {}]  }
   0x1   :  { %s22_s19 = sshll.u32 %s345_s18, 4  ;;  %s321_s22 = scalar_lea.hbm %s416_s3, 1024  ;;  %s23_s19 = int_to_ptr.vmem [resolvable:$true] %s22_s19 }
   0x2   :  { %p322_p0 = scmp.ne.s32.totalorder %s416_s3, %s321_s22  ;;  %p325_p1 = scmp.lt.u32.totalorder %s321_s22, %s416_s3 }
   0x4   :  { %p327_p2 = pnand %p325_p1, %p322_p0 }
   0x6   :  { %330 = shalt.err (!%p327_p2)
}
   0x7   :  { %s331_s27 = scalar_lea.vmem %s23_s19, 1024  ;;  %p336_p4 = scmp.lt.s32.totalorder %s23_s19, %s23_s19 }
   0x8   :  { %p332_p3 = scmp.ne.s32.totalorder %s23_s19, %s331_s27  ;;  %p337_p5 = scmp.lt.s32.totalorder %s331_s27, %s331_s27 }
   0xa   :  { %p338_p6 = por %p337_p5, %p336_p4 }
   0xc   :  { %p339_p7 = pnand %p338_p6, %p332_p3 }
   0xe   :  { %342 = shalt.err (!%p339_p7)
}
   0xf   :  { %s346_s28 = smov 64   ;;  %s347_s29 = smov 4  }
  0x10   :  { %28 = dma.hbm_to_vmem [thread:$0]  %s416_s3, 1024, %s23_s19, [#allocation4], %s346_s28, %s346_s28, %s347_s29  }
  0x11   :  { %343 = dma.done.wait [#allocation4], 1024  }
  0x12   :  { %344 = vsyncadd [#allocation4], 4294966272  ;;  %v348_v0 = vmov 0.0   ;;  %vm349_vm0 = vmmov 0   ;;  %v310_v1 = vld [vmem:[%s414_s1] sm:$0xff]   ;;  %v311_v2 = vld [vmem:[%s414_s1 + $0x8] sm:$0xff]  }
  0x13   :  { %277 = vmatprep.subr.bf16.mxu0 %v348_v0  ;;  %281 = vmatprep.mubr.msk.bf16.mxu0 %vm349_vm0, %v348_v0  ;;  %v313_v3 = vld [vmem:[#allocation3] sm:$0xff]   ;;  %v312_v4 = vld [vmem:[%s413_s0] sm:$0xff]   ;;  %v314_v5 = vld [vmem:[#allocation3 + $0x8] sm:$0xff]   ;;  %vm71_vm1 = vcmask 261120  }
  0x14   :  { %285 = vmatprep.subr.bf16.mxu1 %v348_v0  ;;  %301 = vmatprep.mubr.msk.bf16.mxu1 %vm349_vm0, %v348_v0  ;;  %v315_v6 = vld [vmem:[#allocation3 + $0x10] sm:$0xff]   ;;  %v316_v7 = vld [vmem:[#allocation3 + $0x18] sm:$0xff]   ;;  %v317_v8 = vld [vmem:[#allocation3 + $0x20] sm:$0xff]  }
  0x15   :  { %278 = vmatpush3.bf16.msra.mxu0 %v310_v1  ;;  %286 = vmatpush3.bf16.msra.mxu1 %v313_v3  ;;  %v318_v9 = vld [vmem:[#allocation3 + $0x28] sm:$0xff]   ;;  %v319_v10 = vld [vmem:[#allocation3 + $0x30] sm:$0xff]   ;;  %v320_v11 = vld [vmem:[#allocation3 + $0x38] sm:$0xff]  }
  0x16   :  { %279 = vmatprep.subr.bf16.mxu0 %v348_v0  ;;  %287 = vmatprep.subr.bf16.mxu1 %v348_v0  ;;  %v251_v12 = vld [vmem:[%s415_s2] ss:$0 sm:$0xff] }
  0x17   :  { %v264_v22 = vld [vmem:[%s417_s4] ss:$0 sm:$0xff] }
  0x19   :  { %280 = vmatpush3.bf16.msra.mxu0 %v311_v2  ;;  %288 = vmatpush3.bf16.msra.mxu1 %v314_v5 }
  0x1a   :  { %289 = vmatprep.subr.bf16.mxu1 %v348_v0 }
  0x1c   :  { %282 = vmatmul.mubr.msk.bf16.vlgmr.msra.gmra.mrb[0].mxu0 %vm71_vm1, %v312_v4 }
  0x1d   :  { %290 = vmatpush3.bf16.msra.mxu1 %v315_v6 }
  0x1e   :  { %291 = vmatprep.subr.bf16.mxu1 %v348_v0 }
  0x21   :  { %292 = vmatpush3.bf16.msra.mxu1 %v316_v7 }
  0x22   :  { %293 = vmatprep.subr.bf16.mxu1 %v348_v0 }
  0x25   :  { %294 = vmatpush3.bf16.msra.mxu1 %v317_v8 }
  0x26   :  { %295 = vmatprep.subr.bf16.mxu1 %v348_v0 }
  0x29   :  { %296 = vmatpush3.bf16.msra.mxu1 %v318_v9 }
  0x2a   :  { %297 = vmatprep.subr.bf16.mxu1 %v348_v0 }
  0x2d   :  { %298 = vmatpush3.bf16.msra.mxu1 %v319_v10 }
  0x2e   :  { %299 = vmatprep.subr.bf16.mxu1 %v348_v0 }
  0x31   :  { %300 = vmatpush3.bf16.msra.mxu1 %v320_v11 }
  0xef   :  { %v109_v13 = vpop.f32.mrb[0].mxu0 }
  0xf0   :  { %v110_v14 = vadd.f32 %v251_v12, %v109_v13  ;;  %v283_v15 = vpop.f32.mrb[1].mxu0 }
  0xf1   :  { %v112_v16 = vpop.f32.mrb[2].mxu0 }
  0xf2   :  { %v113_v17 = vadd.f32 %v251_v12, %v112_v16  ;;  %v284_v18 = vpop.f32.mrb[3].mxu0  ;;  %v116_v19 = vmax.f32 %v110_v14, 0.0 }
  0xf4   :  { %v117_v20 = vmax.f32 %v113_v17, 0.0 }
  0xf6   :  { %v120_v21 = vpack.c.bf16 %v117_v20, %v116_v19 }
  0xf8   :  { %302 = vmatmul.mubr.bf16.vlgmr.msra.gmra.mrb[0].mxu1 %v120_v21 }
 0x1cb   :  { %v219_v23 = vpop.f32.mrb[0].mxu1 }
 0x1cc   :  { %v242_v24 = vadd.f32 %v264_v22, %v219_v23  ;;  %v303_v25 = vpop.f32.mrb[1].mxu1 }
 0x1cd   :  { %v222_v26 = vpop.f32.mrb[2].mxu1 }
 0x1ce   :  { %244 = vst [vmem:[%s418_s5] sm:$0xff] %v242_v24  ;;  %v243_v27 = vadd.f32 %v264_v22, %v222_v26  ;;  %v304_v28 = vpop.f32.mrb[3].mxu1 }
 0x1d0   :  { %245 = vst [vmem:[%s418_s5 + $0x8] sm:$0xff] %v243_v27 }
 0x1d1   :  { %250 = vsyncpa [#allocation4], 1 }

</bundles_post_ra>
